<compile_context>
chip_gen: v7x
topology: tpu7x:2x2x1
jax: 0.10.0
libtpu: 0.0.40
codegen_flags: <defaults>
</compile_context>

<pallas_src>
import jax
import jax.numpy as jnp
from jax.experimental import pallas as pl
from jax.experimental.pallas import tpu as pltpu


def _tokenizer_kernel(x_ref, o_ref):
    # x_ref: (TC, TN) VMEM tile of the (C, N) slice; o_ref: (TN, TC) tile of (N, C).
    # Aligned 2-D transpose lowers directly to the XLU (vxpose).
    o_ref[...] = x_ref[...].T


def _tile_candidates(dim, align=128):
    """Full dim first (always legal), then descending 128-multiples that evenly divide it."""
    cands = [dim]
    t = (dim // align) * align
    while t >= align:
        if t != dim and dim % t == 0:
            cands.append(t)
        t -= align
    return cands


def _choose_tiles(C, N, bpe, tile_budget_bytes):
    """Pick (TC, TN).  Preference order among tiles that fit the VMEM budget
    (4 buffers: double-buffered input + output tile):
      1. TC == C  -> each output tile is one contiguous HBM write,
      2. TN == N  -> each input tile is one contiguous HBM read,
      3. largest tile (amortizes the ~0.35 us per-grid-step overhead)."""
    fitting, all_pairs = [], []
    for tc in _tile_candidates(C):
        for tn in _tile_candidates(N):
            all_pairs.append((tc, tn))
            if 4 * tc * tn * bpe <= tile_budget_bytes:
                fitting.append((tc, tn))
    if fitting:
        return max(fitting, key=lambda p: (p[0] == C, p[1] == N, p[0] * p[1]))
    # Nothing fits (huge dims not divisible by 128): take the smallest legal pair.
    return min(all_pairs, key=lambda p: p[0] * p[1])


def tokenizer_forward(x):
    """x: (B, C, H, W) -> (B, H*W, C), matching x.flatten(2).transpose(1, 2)."""
    B, C, H, W = x.shape
    N = H * W
    x_flat = x.reshape(B, C, N)  # flatten(2): free, contiguous reshape

    bpe = jnp.dtype(x.dtype).itemsize
    tile_budget = 24 << 20  # leaves headroom under the 32 MiB scoped-VMEM default
    TC, TN = _choose_tiles(C, N, bpe, tile_budget)
    grid = (B, N // TN, C // TC)

    # VMEM budget: double-buffered input tile + double-buffered output tile + headroom.
    needed = 4 * TC * TN * bpe + (2 << 20)
    vmem_limit = int(max(needed, 32 << 20))

    # TODO(synk): when C < 128 (e.g. raw conv-stem channels) the (B, N, C) output
    # is inherently lane-sparse inside the kernel (masked vst into the (TN, C)
    # VMEM tile); the real fix is to fuse this transpose into the consuming
    # projection matmul instead of materializing (B, N, C).

    return pl.pallas_call(
        _tokenizer_kernel,
        out_shape=jax.ShapeDtypeStruct((B, N, C), x.dtype),
        grid_spec=pltpu.PrefetchScalarGridSpec(
            num_scalar_prefetch=0,
            grid=grid,
            # Batch dim squeezed out of the kernel view (None => size-1, squeezed).
            in_specs=[pl.BlockSpec((None, TC, TN), lambda b, n, c: (b, c, n))],
            out_specs=pl.BlockSpec((None, TN, TC), lambda b, n, c: (b, n, c)),
        ),
        compiler_params=pltpu.CompilerParams(
            dimension_semantics=("parallel", "parallel", "parallel"),
            vmem_limit_bytes=vmem_limit,
        ),
    )(x_flat)


if __name__ == "__main__":
    key = jax.random.PRNGKey(0)
    B, C, H, W = 2, 4, 16, 16
    x = jax.random.normal(key, (B, C, H, W), dtype=jnp.float32)

    out = tokenizer_forward(x)
    out = jax.block_until_ready(out)

    # reference: x.flatten(2).transpose(1, 2)
    ref = jnp.transpose(x.reshape(B, C, H * W), (0, 2, 1))

    assert out.shape == (B, H * W, C), out.shape
    assert out.dtype == x.dtype
    assert jnp.allclose(out, ref), "mismatch vs reference"

    print("KERNEL_OK")
</pallas_src>

<mosaic_0001>
module attributes {stable_mosaic.version = 11 : i64} {
  func.func @_tokenizer_kernel(%arg0: i32, %arg1: i32, %arg2: i32, %arg3: memref<1x4x256xf32, #tpu.memory_space<vmem>>, %arg4: memref<1x256x4xf32, #tpu.memory_space<vmem>>) attributes {dimension_semantics = [#tpu.dimension_semantics<parallel>, #tpu.dimension_semantics<parallel>, #tpu.dimension_semantics<parallel>], iteration_bounds = array<i64: 2, 1, 1>, scalar_prefetch = 0 : i64, scratch_operands = 0 : i64, tpu.core_type = #tpu.core_type<tc>, window_params = [{transform_indices = @transform_0, window_bounds = array<i64: 1, 4, 256>}, {transform_indices = @transform_1, window_bounds = array<i64: 1, 256, 4>}]} {
    %c0 = arith.constant 0 : index
    %c0_0 = arith.constant 0 : index
    %c0_1 = arith.constant 0 : index
    %0 = vector.load %arg3[%c0, %c0_0, %c0_1] : memref<1x4x256xf32, #tpu.memory_space<vmem>>, vector<1x4x256xf32>
    %1 = vector.shape_cast %0 : vector<1x4x256xf32> to vector<4x256xf32>
    %2 = tpu.transpose %1, [1, 0] : vector<4x256xf32> -> vector<256x4xf32>
    %c0_2 = arith.constant 0 : index
    %c0_3 = arith.constant 0 : index
    %c0_4 = arith.constant 0 : index
    %3 = vector.load %arg4[%c0_2, %c0_3, %c0_4] : memref<1x256x4xf32, #tpu.memory_space<vmem>>, vector<1x256x4xf32>
    %4 = vector.shape_cast %3 : vector<1x256x4xf32> to vector<256x4xf32>
    %5 = vector.shape_cast %2 : vector<256x4xf32> to vector<1x256x4xf32>
    tpu.vector_store %arg4[%c0_2, %c0_3, %c0_4], %5 {strides = array<i32>} : memref<1x256x4xf32, #tpu.memory_space<vmem>>, vector<1x256x4xf32>,
    return
  }
  func.func @transform_0(%arg0: i32, %arg1: i32, %arg2: i32) -> (i32, i32, i32) {
    %c0_i32 = arith.constant 0 : i32
    return %arg0, %arg2, %arg1 : i32, i32, i32
  }
  func.func @transform_1(%arg0: i32, %arg1: i32, %arg2: i32) -> (i32, i32, i32) {
    %c0_i32 = arith.constant 0 : i32
    return %arg0, %arg1, %arg2 : i32, i32, i32
  }
}

</mosaic_0001>

<bundles_post_ra>
// kernel: tpu_custom_call.1
= control target key start
LH: loop header
LB: loop body
LE: loop exit
PB: predicated region body
PF: predicated region fallthrough
CT: control target
= control target key end

     0   :  { %6 = vsyncpa [#allocation3], 0  ;;  %s749_s0 = inlined_call_operand.hbm [shape: f32[2,4,256], index: 0, kind: input, shape index: {}]   ;;  %s750_s1 = inlined_call_operand.vmem [shape: f32[2,256,4], index: 1, kind: output, shape index: {}]  }
   0x1   :  { %8 = vsyncpa [#allocation3 + $0x1], 0  ;;  %s558_s6 = smov 0   ;;  %s560_s7 = smov 0  }
   0x2   :  { %s562_s8 = smov 0   ;;  %s564_s9 = smov 0  }
   0x3   :  { %s566_s10 = smov 0   ;;  %s568_s11 = smov 0  }
   0x4 LB: > { %s393_s12 = sadd.s32 4294967295, %s545_s11   ;;  %s33_s13 = sadd.s32 1, %s541_s10  ;;  %s545_s11 = sphi %s568_s11, %s14_s11   ;;  %s541_s10 = sphi %s566_s10, %s760_s10   ;;  %s537_s9 = sphi %s564_s9, %s759_s9   ;;  %s533_s8 = sphi %s562_s8, %s758_s8   ;;  %s529_s7 = sphi %s560_s7, %s757_s7   ;;  %s525_s6 = sphi %s558_s6, %s756_s6  }
   0x5   : > { %p35_p0 = scmp.ge.s32.totalorder %s33_s13, 2  ;;  %s44_s14 = sadd.s32 1, %s533_s8 }
   0x6   : > { %p51_p1 = scmp.ne.s32.totalorder %s533_s8, %s529_s7  ;;  %p52_p2 = scmp.eq.s32.totalorder %s545_s11, 0 }
   0x7   : > { %s762_s13 = smov (%p35_p0, %s33_s13), 0  ;;  %p57_p4 = scmp.ne.s32.totalorder %s529_s7, %s525_s6 }
   0x8   : > { %p594_p3 = por %p52_p2, %p51_p1  ;;  %s37_s16 = ssub.s32 %s541_s10, %s762_s13 }
   0x9   : > { %p58_p5 = scmp.eq.s32.totalorder %s393_s12, 0  ;;  %p42_p6 = scmp.eq.s32.totalorder %s37_s16, 0 }
   0xa   : > { %p414_p8 = scmp.lt.s32.totalorder %s545_s11, 2  ;;  %s111_s19 = sand.u32 1, %s533_s8  }
   0xb   : > { %p601_p7 = por %p58_p5, %p57_p4  ;;  %s406_s20 = sshll.u32 %s541_s10, 7 }
   0xc   : > { %s607_s18 = scalar_select %p42_p6, %s533_s8, %s44_s14  }
   0xd   : > { %s397_s21 = sshll.u32 %s111_s19, 3  ;;  %s614_s24 = scalar_lea.hbm %s749_s0, %s406_s20 }
   0xe   : > { %s115_s25 = scalar_lea.vmem [#allocation2], %s397_s21  ;;  %p618_p9 = pnand %p414_p8, %p594_p3 }
   0xf   : > { %s127_s26 = sshll.u32 %s115_s25, 4  ;;  %s112_s28 = scalar_lea.sflag [#allocation3], %s111_s19  ;;  %s622_s26 = int_to_ptr.vmem [resolvable:$true] %s127_s26 }
  0x10   : > { %s465_s29 = scalar_lea.hbm %s614_s24, 128  ;;  %p467_p13 = pneg %p618_p9 }
  0x11   : > { %p466_p12 = scmp.ne.s32.totalorder %s614_s24, %s465_s29  ;;  %s470_s3 = scalar_lea.hbm %s749_s0, 256 }
  0x12   : > { %p471_p2 = scmp.lt.u32.totalorder %s614_s24, %s749_s0  ;;  %p472_p3 = scmp.lt.u32.totalorder %s470_s3, %s465_s29 }
  0x13   : > { %p468_p0 = pnand %p467_p13, %p466_p12  ;;  %p474_p5 = scmp.lt.u32.totalorder %s465_s29, %s614_s24 }
  0x14   : > { %p473_p4 = por %p472_p3, %p471_p2 }
  0x15   : > { %p469_p1 = pneg %p468_p0 }
  0x16   : > { %p475_p6 = por %p474_p5, %p473_p4 }
  0x18   : > { %p476_p8 = pnand %p475_p6, %p469_p1 }
  0x1a   : > { %479 = shalt.err (!%p476_p8)
}
  0x1b   : > { %s480_s6 = scalar_lea.vmem %s622_s26, 128  ;;  %s547_s12 = smov [#allocation2]  }
  0x1c   : > { %p481_p12 = scmp.ne.s32.totalorder %s622_s26, %s480_s6  ;;  %s485_s14 = sshll.u32 %s547_s12, 4  ;;  %s486_s14 = int_to_ptr.vmem [resolvable:$false] %s485_s14 }
  0x1d   : > { %s487_s15 = scalar_lea.vmem %s486_s14, 256  ;;  %p488_p11 = scmp.lt.s32.totalorder %s622_s26, %s486_s14 }
  0x1e   : > { %p483_p0 = pnand %p481_p12, %p467_p13  ;;  %p489_p2 = scmp.lt.s32.totalorder %s487_s15, %s480_s6 }
  0x20   : > { %p484_p10 = pneg %p483_p0  ;;  %p490_p3 = por %p489_p2, %p488_p11 }
  0x22   : > { %p491_p4 = pnand %p490_p3, %p484_p10 }
  0x24   : > { %494 = shalt.err (!%p491_p4)
}
  0x25   : > { %413 = dma.hbm_to_vmem [thread:$0]  (!%p618_p9), %s614_s24, 128, %s622_s26, %s112_s28  }
  0x26   : > { %p754_p1 = scmp.lt.s32.totalorder %s545_s11, 3  ;;  %p755_p5 = scmp.ge.s32.totalorder %s545_s11, 1 }
  0x28   : > { %p133_p13 = pnand %p755_p5, %p754_p1 }
  0x29   : > { %s138_s16 = sand.u32 (!%p133_p13), 1, %s529_s7  }
  0x2a   : > { %136 = sbr.rel (%p133_p13) target bundleno = 305 (0x131), region = 24  ;;  %s401_s19 = sshll.u32 (!%p133_p13), %s138_s16, 3 }
  0x2b   : > { %s139_s20 = scalar_lea.sflag (!%p133_p13), [#allocation3], %s138_s16  ;;  %s142_s21 = scalar_lea.vmem (!%p133_p13), [#allocation2], %s401_s19 }
  0x31   : > { %520 = dma.done.wait (%p601_p7), %s139_s20, 128  }
  0x32   : > { %522 = vsyncadd (%p601_p7), %s139_s20, 4294967168  ;;  %v182_v0 = vld [vmem:[%s142_s21] sm:$0xff]  ;;  %p170_p9 = scmp.lt.s32.totalorder %s537_s9, 1  ;;  %vm250_vm0 = vcmask 31744  }
  0x33   : > { %186 = vxpose.xlu0.b32.start.end [1/1] (short) %v182_v0, 128  ;;  %v184_v1 = vcombine.high %v182_v0, %v182_v0 }
  0x34   : > { %s764_s9 = smov (!%p170_p9, %s537_s9), 1 }
  0x35   : > { %s407_s22 = sshll.u32 %s764_s9, 8 }
  0x36   : > { %s665_s25 = scalar_lea.vmem %s750_s1, %s407_s22 }
  0x70   : > { %218 = vxpose.xlu0.b32.start.end [1/1] (short) %v184_v1, 128 }
  0xb3   : > { %v202_v2 = vpop.trf.xlu0 }
  0xb4   : > { %251 = vst.msk [vmem:[%s665_s25] sm:$0xff] %vm250_vm0, %v202_v2 }
  0xb7   : > { %v203_v3 = vpop.trf.xlu0 }
  0xb8   : > { %252 = vst.msk [vmem:[%s665_s25 + $0x8] sm:$0xff] %vm250_vm0, %v203_v3 }
  0xbb   : > { %v204_v4 = vpop.trf.xlu0 }
  0xbc   : > { %253 = vst.msk [vmem:[%s665_s25 + $0x10] sm:$0xff] %vm250_vm0, %v204_v4 }
  0xbf   : > { %v205_v5 = vpop.trf.xlu0 }
  0xc0   : > { %254 = vst.msk [vmem:[%s665_s25 + $0x18] sm:$0xff] %vm250_vm0, %v205_v5 }
  0xc3   : > { %v206_v6 = vpop.trf.xlu0 }
  0xc4   : > { %255 = vst.msk [vmem:[%s665_s25 + $0x20] sm:$0xff] %vm250_vm0, %v206_v6 }
  0xc7   : > { %v207_v7 = vpop.trf.xlu0 }
  0xc8   : > { %256 = vst.msk [vmem:[%s665_s25 + $0x28] sm:$0xff] %vm250_vm0, %v207_v7 }
  0xcb   : > { %v208_v8 = vpop.trf.xlu0 }
  0xcc   : > { %257 = vst.msk [vmem:[%s665_s25 + $0x30] sm:$0xff] %vm250_vm0, %v208_v8 }
  0xcf   : > { %v209_v9 = vpop.trf.xlu0 }
  0xd0   : > { %258 = vst.msk [vmem:[%s665_s25 + $0x38] sm:$0xff] %vm250_vm0, %v209_v9 }
  0xd3   : > { %v210_v10 = vpop.trf.xlu0 }
  0xd4   : > { %259 = vst.msk [vmem:[%s665_s25 + $0x40] sm:$0xff] %vm250_vm0, %v210_v10 }
  0xd7   : > { %v211_v11 = vpop.trf.xlu0 }
  0xd8   : > { %260 = vst.msk [vmem:[%s665_s25 + $0x48] sm:$0xff] %vm250_vm0, %v211_v11 }
  0xdb   : > { %v212_v12 = vpop.trf.xlu0 }
  0xdc   : > { %261 = vst.msk [vmem:[%s665_s25 + $0x50] sm:$0xff] %vm250_vm0, %v212_v12 }
  0xdf   : > { %v213_v13 = vpop.trf.xlu0 }
  0xe0   : > { %262 = vst.msk [vmem:[%s665_s25 + $0x58] sm:$0xff] %vm250_vm0, %v213_v13 }
  0xe3   : > { %v214_v14 = vpop.trf.xlu0 }
  0xe4   : > { %263 = vst.msk [vmem:[%s665_s25 + $0x60] sm:$0xff] %vm250_vm0, %v214_v14 }
  0xe7   : > { %v215_v15 = vpop.trf.xlu0 }
  0xe8   : > { %264 = vst.msk [vmem:[%s665_s25 + $0x68] sm:$0xff] %vm250_vm0, %v215_v15 }
  0xeb   : > { %v216_v16 = vpop.trf.xlu0 }
  0xec   : > { %265 = vst.msk [vmem:[%s665_s25 + $0x70] sm:$0xff] %vm250_vm0, %v216_v16 }
  0xef   : > { %v217_v17 = vpop.trf.xlu0 }
  0xf0   : > { %266 = vst.msk [vmem:[%s665_s25 + $0x78] sm:$0xff] %vm250_vm0, %v217_v17 }
  0xf3   : > { %v234_v18 = vpop.trf.xlu0 }
  0xf4   : > { %267 = vst.msk [vmem:[%s665_s25 + $0x80] sm:$0xff] %vm250_vm0, %v234_v18 }
  0xf7   : > { %v235_v19 = vpop.trf.xlu0 }
  0xf8   : > { %268 = vst.msk [vmem:[%s665_s25 + $0x88] sm:$0xff] %vm250_vm0, %v235_v19 }
  0xfb   : > { %v236_v20 = vpop.trf.xlu0 }
  0xfc   : > { %269 = vst.msk [vmem:[%s665_s25 + $0x90] sm:$0xff] %vm250_vm0, %v236_v20 }
  0xff   : > { %v237_v21 = vpop.trf.xlu0 }
 0x100   : > { %270 = vst.msk [vmem:[%s665_s25 + $0x98] sm:$0xff] %vm250_vm0, %v237_v21 }
 0x103   : > { %v238_v22 = vpop.trf.xlu0 }
 0x104   : > { %271 = vst.msk [vmem:[%s665_s25 + $0xa0] sm:$0xff] %vm250_vm0, %v238_v22 }
 0x107   : > { %v239_v23 = vpop.trf.xlu0 }
 0x108   : > { %272 = vst.msk [vmem:[%s665_s25 + $0xa8] sm:$0xff] %vm250_vm0, %v239_v23 }
 0x10b   : > { %v240_v24 = vpop.trf.xlu0 }
 0x10c   : > { %273 = vst.msk [vmem:[%s665_s25 + $0xb0] sm:$0xff] %vm250_vm0, %v240_v24 }
 0x10f   : > { %v241_v25 = vpop.trf.xlu0 }
 0x110   : > { %274 = vst.msk [vmem:[%s665_s25 + $0xb8] sm:$0xff] %vm250_vm0, %v241_v25 }
 0x113   : > { %v242_v26 = vpop.trf.xlu0 }
 0x114   : > { %275 = vst.msk [vmem:[%s665_s25 + $0xc0] sm:$0xff] %vm250_vm0, %v242_v26 }
 0x117   : > { %v243_v27 = vpop.trf.xlu0 }
 0x118   : > { %276 = vst.msk [vmem:[%s665_s25 + $0xc8] sm:$0xff] %vm250_vm0, %v243_v27 }
 0x11b   : > { %v244_v28 = vpop.trf.xlu0 }
 0x11c   : > { %277 = vst.msk [vmem:[%s665_s25 + $0xd0] sm:$0xff] %vm250_vm0, %v244_v28 }
 0x11f   : > { %v245_v29 = vpop.trf.xlu0 }
 0x120   : > { %278 = vst.msk [vmem:[%s665_s25 + $0xd8] sm:$0xff] %vm250_vm0, %v245_v29 }
 0x123   : > { %v246_v30 = vpop.trf.xlu0 }
 0x124   : > { %279 = vst.msk [vmem:[%s665_s25 + $0xe0] sm:$0xff] %vm250_vm0, %v246_v30 }
 0x127   : > { %v247_v31 = vpop.trf.xlu0 }
 0x128   : > { %280 = vst.msk [vmem:[%s665_s25 + $0xe8] sm:$0xff] %vm250_vm0, %v247_v31 }
 0x12b   : > { %v248_v32 = vpop.trf.xlu0 }
 0x12c   : > { %281 = vst.msk [vmem:[%s665_s25 + $0xf0] sm:$0xff] %vm250_vm0, %v248_v32 }
 0x12f   : > { %v249_v33 = vpop.trf.xlu0 }
 0x130   : > { %282 = vst.msk [vmem:[%s665_s25 + $0xf8] sm:$0xff] %vm250_vm0, %v249_v33 }
 0x131 PF: > { %s14_s11 = sadd.s32 1, %s545_s11   ;;  %s756_s6 = smov %s529_s7 }
 0x132   : > { %p11_p7 = scmp.ge.s32.totalorder %s14_s11, 4   ;;  %s757_s7 = smov %s533_s8 }
 0x133   : > { %s758_s8 = smov %s607_s18  ;;  %s759_s9 = smov %s541_s10 }
 0x134   : > { %s760_s10 = smov %s762_s13  ;;  %13 = sbr.rel (!%p11_p7) target bundleno = 4 (0x4), region = 64 }
 0x13b   :  { %319 = vsyncpa [#allocation3], 1 }
 0x13c   :  { %321 = vsyncpa [#allocation3 + $0x1], 1 }

</bundles_post_ra>
